<compile_context>
chip_gen: v6e
topology: v6e:2x2x1
jax: 0.10.0
libtpu: 0.0.40
codegen_flags: <defaults>
</compile_context>

<pallas_src>
import jax
import jax.numpy as jnp
from jax.experimental import pallas as pl
from jax.experimental.pallas import tpu as pltpu


def build_positional_encoding(max_len, embed_dim, dtype=jnp.float32):
    """Exact JAX replica of the module's `pe` buffer, shape (max_len, embed_dim).

    NOTE: the source module (as written) uses a POSITIVE exponent and a
    separate odd-index exponent for the cos channel:
        pe[:, 0::2] = sin(pos * 10000**(even_idx / D))
        pe[:, 1::2] = cos(pos * 10000**(odd_idx  / D))
    We reproduce that element-for-element (the spec is the module, not the
    "standard" sin(pos / 10000**(2i/D)) formula).
    """
    pos = jnp.arange(max_len, dtype=jnp.float32)[:, None]
    even_idx = jnp.arange(0, embed_dim, 2, dtype=jnp.float32)
    odd_idx = jnp.arange(1, embed_dim, 2, dtype=jnp.float32)
    div_even = jnp.power(10000.0, even_idx / embed_dim)
    div_odd = jnp.power(10000.0, odd_idx / embed_dim)
    pe = jnp.zeros((max_len, embed_dim), dtype=jnp.float32)
    pe = pe.at[:, 0::2].set(jnp.sin(pos * div_even))
    pe = pe.at[:, 1::2].set(jnp.cos(pos * div_odd))
    return pe.astype(dtype)


# ----------------------------- kernels --------------------------------------


def _pe_add_rows_kernel(x_ref, pe_ref, o_ref):
    # x/o: (TR, C) tile of one batch element (batch dim squeezed); pe: (TR, C).
    o_ref[...] = x_ref[...] + pe_ref[...]


def _pe_add_batched_kernel(x_ref, pe_ref, o_ref):
    # x/o: (TB, R, C) folded-batch tile; pe: (R, C), broadcast over the tile.
    o_ref[...] = x_ref[...] + pe_ref[...][None]


# ----------------------------- tiling helpers --------------------------------

_TARGET_TILE_BYTES = 4 << 20   # ~4 MiB blocks: >=85% of HBM roofline (measured f32 add)
_BATCH_FOLD_BYTES = 1 << 20    # fold batch into the block when a per-batch slab is smaller


def _sublane_multiple(itemsize):
    # 8 sublanes x 32-bit per vreg; sub-32-bit dtypes pack 2x/4x rows per sublane.
    return max(8, (8 * 4) // itemsize)


def _round_up(v, m):
    return ((v + m - 1) // m) * m


def _row_tile(num_rows, row_bytes, mult, target_bytes):
    """Largest sublane-multiple row tile keeping one block near `target_bytes`."""
    if num_rows * row_bytes <= target_bytes:
        return num_rows  # full dim — always a legal block shape
    tr = (target_bytes // row_bytes) // mult * mult
    return int(max(mult, min(tr, num_rows)))


def _vmem_limit(tile_bytes):
    # x + pe + out tiles, double-buffered, plus headroom; clamp to a range that
    # is safe on v5e (128 MiB physical) and v7x (64 MiB physical per TC).
    return int(min(48 << 20, max(32 << 20, 6 * tile_bytes + (8 << 20))))


# ----------------------------- forward ---------------------------------------


def positional_encoding_forward(x, pe=None):
    """Forward of PositionalEncoding: x + pe[:S], broadcast over batch.

    x:  (B, S, D)
    pe: precomputed table, shape (max_len, D) or (1, max_len, D). Built if None.
    """
    B, S, D = x.shape
    if pe is None:
        pe = build_positional_encoding(S, D, x.dtype)
    if pe.ndim == 3:          # accept the (1, max_len, D) register_buffer layout
        pe = pe[0]
    if pe.shape[0] < S or pe.shape[1] != D:
        raise ValueError(f"pe table {pe.shape} too small for input (S={S}, D={D})")
    pe_s = pe[:S] if pe.shape[0] != S else pe
    if pe_s.dtype != x.dtype:
        pe_s = pe_s.astype(x.dtype)

    itemsize = jnp.dtype(x.dtype).itemsize
    mult = _sublane_multiple(itemsize)

    # Lane-dense view: keep the last dim a multiple of 128 whenever possible so
    # output stores are unmasked full-vreg vst's.
    total = S * D
    if D % 128 == 0:
        R, C = S, D
    elif total % 128 == 0:
        R, C = total // 128, 128
    else:
        R, C = S, D  # fallback: masked partial stores, still correct

    x2 = x.reshape(B, R, C)
    pe2 = pe_s.reshape(R, C)

    row_bytes = C * itemsize
    slab_bytes = R * row_bytes
    cost = pl.CostEstimate(
        flops=B * S * D,
        transcendentals=0,
        bytes_accessed=(2 * B + 1) * S * D * itemsize,
    )

    if slab_bytes >= _BATCH_FOLD_BYTES:
        # Large per-batch slab: tile the row dim; batch innermost so the same PE
        # tile stays resident in VMEM across the inner grid axis.
        tr = _row_tile(R, row_bytes, mult, _TARGET_TILE_BYTES)
        num_r = pl.cdiv(R, tr)
        if num_r * B < 2 and R >= 2 * mult:
            # Keep >=2 grid steps so both v7x TensorCores get work.
            tr = min(R, max(mult, _round_up(pl.cdiv(R, 2), mult)))
            num_r = pl.cdiv(R, tr)
        out = pl.pallas_call(
            _pe_add_rows_kernel,
            out_shape=jax.ShapeDtypeStruct((B, R, C), x.dtype),
            grid=(num_r, B),
            in_specs=[
                pl.BlockSpec((None, tr, C), lambda r, b: (b, r, 0)),  # x, batch squeezed
                pl.BlockSpec((tr, C), lambda r, b: (r, 0)),           # pe, ignores b
            ],
            out_specs=pl.BlockSpec((None, tr, C), lambda r, b: (b, r, 0)),
            compiler_params=pltpu.CompilerParams(
                dimension_semantics=("parallel", "parallel"),
                vmem_limit_bytes=_vmem_limit(tr * row_bytes)),
            cost_estimate=cost,
        )(x2, pe2)
    else:
        # Small per-batch slab: fold batch so each grid step still moves ~4 MiB.
        tb = min(B, max(1, _TARGET_TILE_BYTES // max(slab_bytes, 1)))
        num_b = pl.cdiv(B, tb)
        if num_b < 2 and B >= 2:
            tb = pl.cdiv(B, 2)
            num_b = pl.cdiv(B, tb)
        out = pl.pallas_call(
            _pe_add_batched_kernel,
            out_shape=jax.ShapeDtypeStruct((B, R, C), x.dtype),
            grid=(num_b,),
            in_specs=[
                pl.BlockSpec((tb, R, C), lambda b: (b, 0, 0)),  # x, folded batch
                pl.BlockSpec((R, C), lambda b: (0, 0)),         # pe, resident
            ],
            out_specs=pl.BlockSpec((tb, R, C), lambda b: (b, 0, 0)),
            compiler_params=pltpu.CompilerParams(
                dimension_semantics=("parallel",),
                vmem_limit_bytes=_vmem_limit(tb * slab_bytes)),
            cost_estimate=cost,
        )(x2, pe2)

    return out.reshape(B, S, D)


# TODO(synk): no dropout in this module's forward; nothing further to translate.


if __name__ == "__main__":
    # Small case consistent with the module: batch=2, seq=8, embed_dim=32.
    B, S, D = 2, 8, 32
    max_len = 64
    key = jax.random.PRNGKey(0)
    x = jax.random.normal(key, (B, S, D), dtype=jnp.float32)

    pe = build_positional_encoding(max_len, D, jnp.float32)  # "register_buffer", built once
    out = jax.block_until_ready(positional_encoding_forward(x, pe))

    ref = x + pe[None, :S]
    assert out.shape == (B, S, D)
    assert jnp.allclose(out, ref, atol=1e-6, rtol=1e-6), "mismatch vs reference (small case)"

    # Second check exercising the sequence-tiled (batch-squeezed) path, bf16.
    B2, S2, D2 = 2, 2048, 256
    x_big = jax.random.normal(jax.random.PRNGKey(0), (B2, S2, D2), dtype=jnp.bfloat16)
    pe_big = build_positional_encoding(S2, D2, jnp.bfloat16)
    out_big = jax.block_until_ready(positional_encoding_forward(x_big, pe_big))
    ref_big = x_big + pe_big[None]
    assert out_big.shape == (B2, S2, D2)
    assert jnp.allclose(out_big.astype(jnp.float32), ref_big.astype(jnp.float32),
                        atol=1e-2, rtol=1e-2), "mismatch vs reference (tiled case)"

    print("KERNEL_OK")
</pallas_src>

<mosaic_0001>
module attributes {stable_mosaic.version = 11 : i64} {
  func.func @_pe_add_batched_kernel(%arg0: i32, %arg1: memref<1x2x128xf32, #tpu.memory_space<vmem>>, %arg2: memref<2x128xf32, #tpu.memory_space<vmem>>, %arg3: memref<1x2x128xf32, #tpu.memory_space<vmem>>) attributes {dimension_semantics = [#tpu.dimension_semantics<parallel>], iteration_bounds = array<i64: 2>, scalar_prefetch = 0 : i64, scratch_operands = 0 : i64, tpu.core_type = #tpu.core_type<tc>, window_params = [{transform_indices = @transform_0, window_bounds = array<i64: 1, 2, 128>}, {pipeline_mode = #tpu.pipeline_mode<synchronous>, transform_indices = @transform_1, window_bounds = array<i64: 2, 128>}, {transform_indices = @transform_2, window_bounds = array<i64: 1, 2, 128>}]} {
    %c0 = arith.constant 0 : index
    %c0_0 = arith.constant 0 : index
    %c0_1 = arith.constant 0 : index
    %0 = vector.load %arg1[%c0, %c0_0, %c0_1] : memref<1x2x128xf32, #tpu.memory_space<vmem>>, vector<1x2x128xf32>
    %c0_2 = arith.constant 0 : index
    %c0_3 = arith.constant 0 : index
    %1 = vector.load %arg2[%c0_2, %c0_3] : memref<2x128xf32, #tpu.memory_space<vmem>>, vector<2x128xf32>
    %2 = vector.shape_cast %1 : vector<2x128xf32> to vector<1x2x128xf32>
    %3 = arith.addf %0, %2 : vector<1x2x128xf32>
    %c0_4 = arith.constant 0 : index
    %c0_5 = arith.constant 0 : index
    %c0_6 = arith.constant 0 : index
    %4 = vector.load %arg3[%c0_4, %c0_5, %c0_6] : memref<1x2x128xf32, #tpu.memory_space<vmem>>, vector<1x2x128xf32>
    tpu.vector_store %arg3[%c0_4, %c0_5, %c0_6], %3 {strides = array<i32>} : memref<1x2x128xf32, #tpu.memory_space<vmem>>, vector<1x2x128xf32>,
    return
  }
  func.func @transform_0(%arg0: i32) -> (i32, i32, i32) {
    %c0_i32 = arith.constant 0 : i32
    %c0_i32_0 = arith.constant 0 : i32
    %c0_i32_1 = arith.constant 0 : i32
    return %arg0, %c0_i32, %c0_i32_0 : i32, i32, i32
  }
  func.func @transform_1(%arg0: i32) -> (i32, i32) {
    %c0_i32 = arith.constant 0 : i32
    %c0_i32_0 = arith.constant 0 : i32
    %c0_i32_1 = arith.constant 0 : i32
    return %c0_i32, %c0_i32_0 : i32, i32
  }
  func.func @transform_2(%arg0: i32) -> (i32, i32, i32) {
    %c0_i32 = arith.constant 0 : i32
    %c0_i32_0 = arith.constant 0 : i32
    %c0_i32_1 = arith.constant 0 : i32
    return %arg0, %c0_i32, %c0_i32_0 : i32, i32, i32
  }
}

</mosaic_0001>

<bundles_post_ra>
// kernel: tpu_custom_call.1
= control target key start
LH: loop header
LB: loop body
LE: loop exit
PB: predicated region body
PF: predicated region fallthrough
CT: control target
= control target key end

     0   :  { %7 = vsyncpa [#allocation3], 0  ;;  %s649_s0 = inlined_call_operand.hbm [shape: f32[2,2,128], index: 0, kind: input, shape index: {}]   ;;  %s650_s1 = inlined_call_operand.hbm [shape: f32[2,128], index: 1, kind: input, shape index: {}]   ;;  %s651_s2 = inlined_call_operand.hbm [shape: f32[2,2,128], index: 2, kind: output, shape index: {}]  }
   0x1   :  { %9 = vsyncpa [#allocation3 + $0x1], 0 }
   0x2   :  { %10 = vsyncpa [#allocation6], 0 }
   0x3   :  { %11 = vsyncpa [#allocation4], 0 }
   0x4   :  { %13 = vsyncpa [#allocation4 + $0x1], 0  ;;  %s483_s9 = smov 0   ;;  %s485_s10 = smov 0  }
   0x5   :  { %s487_s11 = smov 0   ;;  %s489_s12 = smov 0  }
   0x6 LB: > { %s504_s13 = sadd.s32 4294967295, %s463_s12   ;;  %s270_s14 = sadd.s32 4294967294, %s463_s12   ;;  %s463_s12 = sphi %s489_s12, %s674_s12   ;;  %s459_s11 = sphi %s487_s11, %s673_s11   ;;  %s455_s10 = sphi %s485_s10, %s672_s10   ;;  %s451_s9 = sphi %s483_s9, %s671_s9  }
   0x7   : > { %p39_p0 = scmp.ne.s32.totalorder %s455_s10, %s451_s9  ;;  %p652_p1 = scmp.eq.s32.totalorder %s504_s13, 0 }
   0x8   : > { %p90_p3 = scmp.eq.s32.totalorder %s270_s14, 1  ;;  %p271_p5 = scmp.ge.s32.totalorder %s463_s12, 1 }
   0x9   : > { %p513_p4 = por %p652_p1, %p39_p0  ;;  %p97_p7 = scmp.lt.s32.totalorder %s463_s12, 3 }
   0xa   : > { %p518_p6 = por %p90_p3, %p39_p0  ;;  %s465_s18 = smov [#allocation5]  }
   0xb   : > { %s656_s15 = scalar_select %p513_p4, 1, 0 }
   0xc   : > { %s657_s16 = scalar_select %p518_p6, 1, 0 }
   0xd   : > { %p523_p8 = pnand %p271_p5, %p97_p7  ;;  %s110_s19 = sshll.u32 %s465_s18, 4  ;;  %s111_s19 = int_to_ptr.vmem [resolvable:$true] %s110_s19 }
   0xe   : > { %s531_s20 = sadd.s32 1, %s463_s12   ;;  %s26_s24 = sadd.s32 1, %s459_s11 }
   0xf   : > { %s658_s17 = scalar_select %p523_p8, 1, 0 }
  0x10   : > { %p292_p10 = pneg %p523_p8  ;;  %s23_s22 = ssub.s32 %s463_s12, %s531_s20 }
  0x11   : > { %p541_p12 = scmp.eq.s32.totalorder %s23_s22, 0  ;;  %p33_p13 = scmp.ne.s32.totalorder %s459_s11, %s455_s10 }
  0x12   : > { %p535_p11 = pnand %p292_p10, %p652_p1  ;;  %s352_s25 = scalar_lea.vmem %s111_s19, 32 }
  0x13   : > { %p353_p3 = scmp.ne.s32.totalorder %s111_s19, %s352_s25  ;;  %p360_p9 = scmp.lt.s32.totalorder %s111_s19, %s111_s19 }
  0x14   : > { %p343_p0 = pneg %p535_p11  ;;  %p361_p2 = scmp.lt.s32.totalorder %s352_s25, %s352_s25 }
  0x16   : > { %p355_p5 = pnand %p353_p3, %p343_p0  ;;  %p362_p10 = por %p361_p2, %p360_p9 }
  0x18   : > { %p356_p7 = pneg %p355_p5 }
  0x1a   : > { %p363_p1 = pnand %p362_p10, %p356_p7 }
  0x1c   : > { %366 = shalt.err (!%p363_p1)
}
  0x1d   : > { %295 = dma.hbm_to_vmem [thread:$0]  (!%p535_p11), %s650_s1, 32, %s111_s19, [#allocation6]  }
  0x1e   : > { %s558_s28 = scalar_select %p541_p12, %s459_s11, %s26_s24  }
  0x1f   : > { %p34_p1 = scmp.eq.s32.totalorder %s463_s12, 0  ;;  %p661_p2 = scmp.eq.s32.totalorder %s504_s13, 1 }
  0x20   : > { %p305_p0 = scmp.lt.s32.totalorder %s463_s12, 2  ;;  %s121_s30 = sand.u32 1, %s459_s11  }
  0x21   : > { %p566_p9 = por %p661_p2, %p33_p13  ;;  %p35_p3 = por %p34_p1, %p33_p13 }
  0x22   : > { %s274_s3 = sshll.u32 %s121_s30, 1  ;;  %s275_s4 = sshll.u32 %s463_s12, 5 }
  0x23   : > { %s662_s29 = scalar_select %p566_p9, 1, 0 }
  0x24   : > { %s579_s7 = scalar_lea.hbm %s649_s0, %s275_s4  ;;  %s125_s8 = scalar_lea.vmem [#allocation2], %s274_s3 }
  0x25   : > { %s132_s14 = sshll.u32 %s125_s8, 4  ;;  %p581_p11 = pnand %p305_p0, %p35_p3  ;;  %s133_s14 = int_to_ptr.vmem [resolvable:$true] %s132_s14 }
  0x26   : > { %s122_s19 = scalar_lea.sflag [#allocation3], %s121_s30  ;;  %s367_s21 = scalar_lea.hbm %s579_s7, 32 }
  0x27   : > { %p368_p12 = scmp.ne.s32.totalorder %s579_s7, %s367_s21  ;;  %p369_p13 = pneg %p581_p11 }
  0x28   : > { %s372_s24 = scalar_lea.hbm %s649_s0, 64  ;;  %p373_p10 = scmp.lt.s32.totalorder %s579_s7, %s649_s0 }
  0x29   : > { %p370_p5 = pnand %p369_p13, %p368_p12  ;;  %p374_p1 = scmp.lt.s32.totalorder %s372_s24, %s367_s21 }
  0x2b   : > { %p371_p7 = pneg %p370_p5  ;;  %p375_p2 = por %p374_p1, %p373_p10 }
  0x2d   : > { %p376_p0 = pnand %p375_p2, %p371_p7 }
  0x2f   : > { %379 = shalt.err (!%p376_p0)
}
  0x30   : > { %s380_s27 = scalar_lea.vmem %s133_s14, 32  ;;  %s466_s30 = smov [#allocation2]  }
  0x31   : > { %p381_p3 = scmp.ne.s32.totalorder %s133_s14, %s380_s27  ;;  %s385_s3 = sshll.u32 %s466_s30, 4  ;;  %s386_s3 = int_to_ptr.vmem [resolvable:$false] %s385_s3 }
  0x32   : > { %s387_s4 = scalar_lea.vmem %s386_s3, 64  ;;  %p388_p12 = scmp.lt.s32.totalorder %s133_s14, %s386_s3 }
  0x33   : > { %p383_p6 = pnand %p381_p3, %p369_p13  ;;  %p389_p5 = scmp.lt.s32.totalorder %s387_s4, %s380_s27 }
  0x35   : > { %p384_p9 = pneg %p383_p6  ;;  %p390_p4 = por %p389_p5, %p388_p12 }
  0x37   : > { %p391_p8 = pnand %p390_p4, %p384_p9 }
  0x39   : > { %394 = shalt.err (!%p391_p8)
}
  0x3a   : > { %299 = dma.hbm_to_vmem [thread:$0]  (!%p581_p11), %s579_s7, 32, %s133_s14, %s122_s19  }
  0x3b   : > { %p664_p7 = scmp.ne.s32.totalorder %s658_s17, 0 }
  0x3c   : > { %s602_s5 = sand.u32 (!%p664_p7), 1, %s455_s10   ;;  %p665_p6 = scmp.ne.s32.totalorder (!%p664_p7), %s656_s15, 0 }
  0x3d   : > { %141 = sbr.rel (%p664_p7) target bundleno = 95 (0x5f), region = 28  ;;  %s277_s6 = sshll.u32 (!%p664_p7), %s602_s5, 1 }
  0x3e   : > { %s144_s8 = scalar_lea.sflag (!%p664_p7), [#allocation3], %s602_s5  ;;  %s147_s21 = scalar_lea.vmem (!%p664_p7), [#allocation2], %s277_s6 }
  0x42   : > { %438 = dma.done.wait (%p665_p6), %s144_s8, 32  }
  0x43   : > { %440 = vsyncadd (%p665_p6), %s144_s8, 4294967264  ;;  %p666_p4 = scmp.eq.s32.totalorder %s504_s13, 0 }
  0x45   : > { %442 = dma.done.wait (%p666_p4), [#allocation6], 32   ;;  %p667_p8 = pmov %p666_p4 }
  0x46   : > { %s171_s17 = scalar_lea.vmem [#allocation7], %s277_s6  ;;  %s281_s14 = sshll.u32 %s504_s13, 5  ;;  %v172_v0 = vld [vmem:[%s147_s21] sm:$0x3]  ;;  %v173_v1 = vld [vmem:[#allocation5] sm:$0x3] }
  0x47   : > { %444 = vsyncadd (%p667_p8), [#allocation6], 4294967264  ;;  %s190_s7 = sshll.u32 %s171_s17, 4  ;;  %v174_v2 = vadd.f32 %v173_v1, %v172_v0  ;;  %s188_s15 = scalar_lea.hbm %s651_s2, %s281_s14  ;;  %s191_s7 = int_to_ptr.vmem [resolvable:$true] %s190_s7 }
  0x48   : > { %s177_s22 = scalar_lea.sflag [#allocation4], %s602_s5  ;;  %s395_s23 = scalar_lea.vmem %s191_s7, 32 }
  0x49   : > { %175 = vst [vmem:[%s171_s17] sm:$0x3] %v174_v2  ;;  %p396_p9 = scmp.ne.s32.totalorder %s191_s7, %s395_s23  ;;  %p668_p11 = scmp.ne.s32.totalorder %s662_s29, 0 }
  0x4a   : > { %s467_s24 = smov [#allocation7]  }
  0x4b   : > { %p397_p13 = pnand %p396_p9, %p668_p11  ;;  %s399_s25 = sshll.u32 %s467_s24, 4  ;;  %s400_s25 = int_to_ptr.vmem [resolvable:$false] %s399_s25 }
  0x4c   : > { %s401_s26 = scalar_lea.vmem %s400_s25, 64  ;;  %p402_p1 = scmp.lt.s32.totalorder %s191_s7, %s400_s25 }
  0x4d   : > { %p398_p10 = pneg %p397_p13  ;;  %p403_p2 = scmp.lt.s32.totalorder %s401_s26, %s395_s23 }
  0x4f   : > { %p404_p0 = por %p403_p2, %p402_p1 }
  0x51   : > { %p405_p3 = pnand %p404_p0, %p398_p10 }
  0x53   : > { %408 = shalt.err (!%p405_p3)
}
  0x54   : > { %s409_s13 = scalar_lea.hbm %s188_s15, 32  ;;  %s413_s3 = scalar_lea.hbm %s651_s2, 64 }
  0x55   : > { %p410_p12 = scmp.ne.s32.totalorder %s188_s15, %s409_s13  ;;  %p414_p6 = scmp.lt.s32.totalorder %s188_s15, %s651_s2 }
  0x56   : > { %p415_p4 = scmp.lt.s32.totalorder %s413_s3, %s409_s13 }
  0x57   : > { %p411_p5 = pnand %p410_p12, %p668_p11 }
  0x58   : > { %p416_p8 = por %p415_p4, %p414_p6 }
  0x59   : > { %p412_p7 = pneg %p411_p5 }
  0x5b   : > { %p417_p9 = pnand %p416_p8, %p412_p7 }
  0x5d   : > { %420 = shalt.err (!%p417_p9)
}
  0x5e   : > { %290 = dma.vmem_to_hbm [thread:$0]  (%p668_p11), %s191_s7, 32, %s188_s15, %s177_s22  }
  0x5f PF: > { %s202_s6 = sand.u32 1, %s451_s9   ;;  %p669_p13 = scmp.ne.s32.totalorder %s657_s16, 0 }
  0x60   : > { %p670_p10 = scmp.ge.s32.totalorder %s463_s12, 2  ;;  %s203_s8 = scalar_lea.sflag [#allocation4], %s202_s6 }
  0x62   : > { %p301_p1 = pnand %p670_p10, %p669_p13 }
  0x64   : > { %p302_p2 = pneg %p301_p1 }
  0x66   : > { %446 = dma.done.wait (%p302_p2), %s203_s8, 32  }
  0x67   : > { %448 = vsyncadd (%p302_p2), %s203_s8, 4294967264  ;;  %p16_p0 = scmp.ge.s32.totalorder %s531_s20, 4   ;;  %s671_s9 = smov %s455_s10 }
  0x68   : > { %s672_s10 = smov %s459_s11  ;;  %s673_s11 = smov %s558_s28 }
  0x69   : > { %s674_s12 = smov %s531_s20  ;;  %18 = sbr.rel (!%p16_p0) target bundleno = 6 (0x6), region = 77 }
  0x6e   :  { %208 = vsyncpa [#allocation3], 1 }
  0x6f   :  { %210 = vsyncpa [#allocation3 + $0x1], 1 }
  0x70   :  { %211 = vsyncpa [#allocation6], 1 }
  0x71   :  { %212 = vsyncpa [#allocation4], 1 }
  0x72   :  { %214 = vsyncpa [#allocation4 + $0x1], 1 }

</bundles_post_ra>
